<compile_context>
chip_gen: v6e
topology: v6e:2x2x1
jax: 0.10.0
libtpu: 0.0.40
codegen_flags: <defaults>
</compile_context>

<pallas_src>
import jax
import jax.numpy as jnp
from jax.experimental import pallas as pl
from jax.experimental.pallas import tpu as pltpu

_SUBLANE = 8
_ROW_CHUNK = 64          # spectra rows per inner step: a (64, 128) f32 slab = 8 vregs


def _round_up(v, m):
    return ((v + m - 1) // m) * m


def _lorentz_kernel(num_ref, g2_ref, diff2_ref, bg_ref, out_ref, lor_ref):
    # num_ref  : (TS, P)   a * gamma^2 for this spectra tile
    # g2_ref   : (TS, P)   gamma^2
    # diff2_ref: (P, L)    (x - peak)^2, grid-invariant (block index constant)
    # bg_ref   : (1, 1)    background scalar (SMEM)
    # out_ref  : (TS, L)
    # lor_ref  : (TS, P, L)
    TS, P = num_ref.shape
    L = out_ref.shape[1]
    bg = bg_ref[0, 0]
    for s0 in range(0, TS, _ROW_CHUNK):              # static unroll over row chunks
        rt = min(_ROW_CHUNK, TS - s0)
        acc = jnp.zeros((rt, L), jnp.float32)
        for p in range(P):                           # static unroll; P is small
            den = g2_ref[s0:s0 + rt, p:p + 1] + diff2_ref[p:p + 1, :]   # (rt, L)
            r = pl.reciprocal(den, approx=True)      # EUP slot, VALU stays free
            r = r * (2.0 - den * r)                  # one Newton step -> ~f32 exact
            lor_p = num_ref[s0:s0 + rt, p:p + 1] * r                     # (rt, L)
            lor_ref[s0:s0 + rt, p, :] = lor_p
            acc = acc + lor_p
        out_ref[s0:s0 + rt, :] = acc + bg


def _pick_spectra_tile(S, P, L):
    """Pick the spectra tile TS and the padded spectra count."""
    row_lor_bytes = 4 * P * L                         # lorentz bytes per spectrum row
    ts_bw = max(_SUBLANE, (2 << 20) // row_lor_bytes)  # ~2 MiB lorentz blocks
    row_vmem_bytes = 2 * 4 * (P * L + L + 2 * P)       # double-buffered f32 per row
    ts_vmem = max(_SUBLANE, (24 << 20) // row_vmem_bytes)  # stay well inside v7x VMEM
    ts = int(min(512, ts_bw, ts_vmem))
    ts -= ts % _SUBLANE
    ts = max(_SUBLANE, ts)
    ts = min(ts, _round_up(S, _SUBLANE))
    # v7x megacore: prefer >= 2 grid steps when there is enough work for 2 TCs.
    if _round_up(S, ts) // ts < 2 and S > 2 * _SUBLANE:
        ts = max(_SUBLANE, _round_up((S + 1) // 2, _SUBLANE))
    # Prefer a tile that divides S exactly (no padding / no post-kernel slice).
    for cand in range(ts, max(_SUBLANE, ts // 4) - 1, -_SUBLANE):
        if S % cand == 0:
            ts = cand
            break
    return ts, _round_up(S, ts)


def batched_lorentzian_forward(x, raw_a, raw_gamma, raw_background,
                               peak_positions, gamma_min, gamma_max):
    """Parameter transforms in plain JAX; the Lorentzian hot path in Pallas."""
    S, P = raw_a.shape
    L = x.shape[0]

    # Parameter transforms (cheap S*P work) stay in XLA.
    a = jnp.exp(raw_a).astype(jnp.float32)                               # (S, P)
    gamma = (jax.nn.sigmoid(raw_gamma).astype(jnp.float32)
             * (gamma_max - gamma_min) + gamma_min)                      # (S, P)
    background = jnp.exp(raw_background).astype(jnp.float32)             # (1,)

    g2 = gamma * gamma                                                   # (S, P)
    num = a * g2                                                         # (S, P)
    diff = x[None, :].astype(jnp.float32) - peak_positions[:, None].astype(jnp.float32)
    diff2 = diff * diff                                                  # (P, L)

    ts, s_pad = _pick_spectra_tile(S, P, L)
    if s_pad != S:
        pad = s_pad - S
        # Padded rows: num = 0, g2 = 1  ->  lorentz == 0, never divides by zero.
        num = jnp.concatenate([num, jnp.zeros((pad, P), jnp.float32)], axis=0)
        g2 = jnp.concatenate([g2, jnp.ones((pad, P), jnp.float32)], axis=0)

    bg2d = background.reshape(1, 1)
    grid = (s_pad // ts,)

    # Advisory cost estimate so XLA schedules the exp/sigmoid prologue and the
    # lorentz consumers around the custom call.
    flops = 6 * s_pad * P * L + s_pad * L
    bytes_accessed = 4 * (s_pad * P * L + s_pad * L + 2 * s_pad * P + P * L + 1)
    cost = pl.CostEstimate(flops=flops, transcendentals=s_pad * P * L,
                           bytes_accessed=bytes_accessed)

    # Explicit VMEM budget (double-buffered blocks + headroom), safe on v7x (64 MiB).
    block_bytes = 8 * (ts * P * L + ts * L + 2 * ts * P + P * L)
    vmem_limit = int(min(48 << 20, max(16 << 20, 2 * block_bytes)))

    out_p, lor_p = pl.pallas_call(
        _lorentz_kernel,
        out_shape=(
            jax.ShapeDtypeStruct((s_pad, L), jnp.float32),
            jax.ShapeDtypeStruct((s_pad, P, L), jnp.float32),
        ),
        grid=grid,
        in_specs=[
            pl.BlockSpec((ts, P), lambda i: (i, 0)),        # num = a * gamma^2
            pl.BlockSpec((ts, P), lambda i: (i, 0)),        # g2  = gamma^2
            pl.BlockSpec((P, L), lambda i: (0, 0)),         # (x - peak)^2, VMEM-resident
            pl.BlockSpec(memory_space=pltpu.SMEM),          # background scalar
        ],
        out_specs=(
            pl.BlockSpec((ts, L), lambda i: (i, 0)),        # summed output
            pl.BlockSpec((ts, P, L), lambda i: (i, 0, 0)),  # lorentz
        ),
        compiler_params=pltpu.CompilerParams(
            dimension_semantics=("parallel",),
            vmem_limit_bytes=vmem_limit),
        cost_estimate=cost,
    )(num, g2, diff2, bg2d)

    out = out_p if s_pad == S else out_p[:S]
    lorentz = lor_p if s_pad == S else lor_p[:S]

    # Match PyTorch return shapes: a, gamma -> (S, P, 1), background -> (1,)
    return out, lorentz, a[:, :, None], gamma[:, :, None], background


def _reference(x, raw_a, raw_gamma, raw_background, peak_positions,
               gamma_min, gamma_max):
    a_ref = jnp.exp(raw_a)[:, :, None]
    g_ref = (jax.nn.sigmoid(raw_gamma)[:, :, None]
             * (gamma_max - gamma_min) + gamma_min)
    bg_ref = jnp.exp(raw_background)
    lor_ref = (a_ref * g_ref ** 2
               / ((x[None, None, :] - peak_positions[None, :, None]) ** 2
                  + g_ref ** 2))
    out_ref = lor_ref.sum(axis=1) + bg_ref
    return out_ref, lor_ref, a_ref, g_ref, bg_ref


def _run_case(key, S, P, L, gamma_min, gamma_max):
    k1, k2 = jax.random.split(key)
    init_a, init_gamma, init_background = 1.0, 10.0, 0.1
    init_gamma_scaled = (init_gamma - gamma_min) / (gamma_max - gamma_min)
    raw_a = (jnp.log(jnp.full((S, P), init_a, dtype=jnp.float32))
             + 0.1 * jax.random.normal(k1, (S, P), dtype=jnp.float32))
    raw_gamma = (jnp.log(init_gamma_scaled / (1.0 - init_gamma_scaled))
                 * jnp.ones((S, P), dtype=jnp.float32)
                 + 0.1 * jax.random.normal(k2, (S, P), dtype=jnp.float32))
    raw_background = jnp.log(jnp.array([init_background], dtype=jnp.float32))
    peak_positions = jnp.linspace(0.1 * L, 0.9 * L, P, dtype=jnp.float32)
    x = jnp.linspace(0.0, float(L - 1), L, dtype=jnp.float32)

    out, lorentz, a, gamma, background = batched_lorentzian_forward(
        x, raw_a, raw_gamma, raw_background, peak_positions,
        gamma_min, gamma_max)
    jax.block_until_ready((out, lorentz, a, gamma, background))

    out_r, lor_r, a_r, g_r, bg_r = _reference(
        x, raw_a, raw_gamma, raw_background, peak_positions,
        gamma_min, gamma_max)

    assert out.shape == (S, L) and lorentz.shape == (S, P, L)
    assert a.shape == (S, P, 1) and gamma.shape == (S, P, 1)
    assert background.shape == (1,)
    assert jnp.allclose(lorentz, lor_r, rtol=1e-5, atol=1e-5)
    assert jnp.allclose(out, out_r, rtol=1e-5, atol=1e-5)
    assert jnp.allclose(a, a_r, rtol=1e-6, atol=1e-6)
    assert jnp.allclose(gamma, g_r, rtol=1e-6, atol=1e-6)
    assert jnp.allclose(background, bg_r, rtol=1e-6, atol=1e-6)


if __name__ == "__main__":
    key = jax.random.PRNGKey(0)
    k_a, k_b = jax.random.split(key)

    # Case 1: lane/sublane-aligned small problem (S=8 spectra, P=8 peaks, L=128).
    _run_case(k_a, S=8, P=8, L=128, gamma_min=5.0, gamma_max=20.0)

    # Case 2: ragged sizes exercising the padding path (S=6, P=5, L=256).
    _run_case(k_b, S=6, P=5, L=256, gamma_min=5.0, gamma_max=20.0)

    print("KERNEL_OK")
</pallas_src>

<mosaic_0001>
module attributes {stable_mosaic.version = 11 : i64} {
  func.func @_lorentz_kernel(%arg0: i32, %arg1: memref<8x8xf32, #tpu.memory_space<vmem>>, %arg2: memref<8x8xf32, #tpu.memory_space<vmem>>, %arg3: memref<8x128xf32, #tpu.memory_space<vmem>>, %arg4: memref<1x1xf32, #tpu.memory_space<smem>>, %arg5: memref<8x128xf32, #tpu.memory_space<vmem>>, %arg6: memref<8x8x128xf32, #tpu.memory_space<vmem>>) attributes {dimension_semantics = [#tpu.dimension_semantics<parallel>], iteration_bounds = array<i64: 1>, scalar_prefetch = 0 : i64, scratch_operands = 0 : i64, tpu.core_type = #tpu.core_type<tc>, window_params = [{transform_indices = @transform_0, window_bounds = array<i64: 8, 8>}, {transform_indices = @transform_1, window_bounds = array<i64: 8, 8>}, {pipeline_mode = #tpu.pipeline_mode<synchronous>, transform_indices = @transform_2, window_bounds = array<i64: 8, 128>}, {transform_indices = @transform_3, window_bounds = array<i64: 1, 1>}, {transform_indices = @transform_4, window_bounds = array<i64: 8, 128>}, {transform_indices = @transform_5, window_bounds = array<i64: 8, 8, 128>}]} {
    %c0 = arith.constant 0 : index
    %c0_0 = arith.constant 0 : index
    %0 = memref.load %arg4[%c0, %c0_0] : memref<1x1xf32, #tpu.memory_space<smem>>
    %cst = arith.constant 0.000000e+00 : f32
    %1 = vector.broadcast %cst : f32 to vector<8x128xf32>
    %c0_1 = arith.constant 0 : index
    %c0_2 = arith.constant 0 : index
    %2 = vector.load %arg2[%c0_1, %c0_2] : memref<8x8xf32, #tpu.memory_space<vmem>>, vector<8x1xf32>
    %c0_3 = arith.constant 0 : index
    %c0_4 = arith.constant 0 : index
    %3 = vector.load %arg3[%c0_3, %c0_4] : memref<8x128xf32, #tpu.memory_space<vmem>>, vector<1x128xf32>
    %4 = vector.broadcast %2 : vector<8x1xf32> to vector<8x128xf32>
    %5 = vector.broadcast %3 : vector<1x128xf32> to vector<8x128xf32>
    %6 = arith.addf %4, %5 : vector<8x128xf32>
    %7 = tpu.reciprocal %6 {approx = true} : vector<8x128xf32> -> vector<8x128xf32>
    %8 = arith.mulf %6, %7 : vector<8x128xf32>
    %cst_5 = arith.constant 2.000000e+00 : f32
    %9 = vector.broadcast %cst_5 : f32 to vector<8x128xf32>
    %10 = arith.subf %9, %8 : vector<8x128xf32>
    %11 = arith.mulf %7, %10 : vector<8x128xf32>
    %c0_6 = arith.constant 0 : index
    %c0_7 = arith.constant 0 : index
    %12 = vector.load %arg1[%c0_6, %c0_7] : memref<8x8xf32, #tpu.memory_space<vmem>>, vector<8x1xf32>
    %13 = vector.broadcast %12 : vector<8x1xf32> to vector<8x128xf32>
    %14 = arith.mulf %13, %11 : vector<8x128xf32>
    %c0_8 = arith.constant 0 : index
    %c0_9 = arith.constant 0 : index
    %c0_10 = arith.constant 0 : index
    %15 = vector.load %arg6[%c0_8, %c0_9, %c0_10] : memref<8x8x128xf32, #tpu.memory_space<vmem>>, vector<8x1x128xf32>
    %16 = vector.shape_cast %15 : vector<8x1x128xf32> to vector<8x128xf32>
    %17 = vector.shape_cast %14 : vector<8x128xf32> to vector<8x1x128xf32>
    tpu.vector_store %arg6[%c0_8, %c0_9, %c0_10], %17 {strides = array<i32>} : memref<8x8x128xf32, #tpu.memory_space<vmem>>, vector<8x1x128xf32>,
    %18 = arith.addf %1, %14 : vector<8x128xf32>
    %c0_11 = arith.constant 0 : index
    %c1 = arith.constant 1 : index
    %19 = vector.load %arg2[%c0_11, %c1] : memref<8x8xf32, #tpu.memory_space<vmem>>, vector<8x1xf32>
    %c1_12 = arith.constant 1 : index
    %c0_13 = arith.constant 0 : index
    %20 = vector.load %arg3[%c1_12, %c0_13] : memref<8x128xf32, #tpu.memory_space<vmem>>, vector<1x128xf32>
    %21 = vector.broadcast %19 : vector<8x1xf32> to vector<8x128xf32>
    %22 = vector.broadcast %20 : vector<1x128xf32> to vector<8x128xf32>
    %23 = arith.addf %21, %22 : vector<8x128xf32>
    %24 = tpu.reciprocal %23 {approx = true} : vector<8x128xf32> -> vector<8x128xf32>
    %25 = arith.mulf %23, %24 : vector<8x128xf32>
    %cst_14 = arith.constant 2.000000e+00 : f32
    %26 = vector.broadcast %cst_14 : f32 to vector<8x128xf32>
    %27 = arith.subf %26, %25 : vector<8x128xf32>
    %28 = arith.mulf %24, %27 : vector<8x128xf32>
    %c0_15 = arith.constant 0 : index
    %c1_16 = arith.constant 1 : index
    %29 = vector.load %arg1[%c0_15, %c1_16] : memref<8x8xf32, #tpu.memory_space<vmem>>, vector<8x1xf32>
    %30 = vector.broadcast %29 : vector<8x1xf32> to vector<8x128xf32>
    %31 = arith.mulf %30, %28 : vector<8x128xf32>
    %c0_17 = arith.constant 0 : index
    %c1_18 = arith.constant 1 : index
    %c0_19 = arith.constant 0 : index
    %32 = vector.load %arg6[%c0_17, %c1_18, %c0_19] : memref<8x8x128xf32, #tpu.memory_space<vmem>>, vector<8x1x128xf32>
    %33 = vector.shape_cast %32 : vector<8x1x128xf32> to vector<8x128xf32>
    %34 = vector.shape_cast %31 : vector<8x128xf32> to vector<8x1x128xf32>
    tpu.vector_store %arg6[%c0_17, %c1_18, %c0_19], %34 {strides = array<i32>} : memref<8x8x128xf32, #tpu.memory_space<vmem>>, vector<8x1x128xf32>,
    %35 = arith.addf %18, %31 : vector<8x128xf32>
    %c0_20 = arith.constant 0 : index
    %c2 = arith.constant 2 : index
    %36 = vector.load %arg2[%c0_20, %c2] : memref<8x8xf32, #tpu.memory_space<vmem>>, vector<8x1xf32>
    %c2_21 = arith.constant 2 : index
    %c0_22 = arith.constant 0 : index
    %37 = vector.load %arg3[%c2_21, %c0_22] : memref<8x128xf32, #tpu.memory_space<vmem>>, vector<1x128xf32>
    %38 = vector.broadcast %36 : vector<8x1xf32> to vector<8x128xf32>
    %39 = vector.broadcast %37 : vector<1x128xf32> to vector<8x128xf32>
    %40 = arith.addf %38, %39 : vector<8x128xf32>
    %41 = tpu.reciprocal %40 {approx = true} : vector<8x128xf32> -> vector<8x128xf32>
    %42 = arith.mulf %40, %41 : vector<8x128xf32>
    %cst_23 = arith.constant 2.000000e+00 : f32
    %43 = vector.broadcast %cst_23 : f32 to vector<8x128xf32>
    %44 = arith.subf %43, %42 : vector<8x128xf32>
    %45 = arith.mulf %41, %44 : vector<8x128xf32>
    %c0_24 = arith.constant 0 : index
    %c2_25 = arith.constant 2 : index
    %46 = vector.load %arg1[%c0_24, %c2_25] : memref<8x8xf32, #tpu.memory_space<vmem>>, vector<8x1xf32>
    %47 = vector.broadcast %46 : vector<8x1xf32> to vector<8x128xf32>
    %48 = arith.mulf %47, %45 : vector<8x128xf32>
    %c0_26 = arith.constant 0 : index
    %c2_27 = arith.constant 2 : index
    %c0_28 = arith.constant 0 : index
    %49 = vector.load %arg6[%c0_26, %c2_27, %c0_28] : memref<8x8x128xf32, #tpu.memory_space<vmem>>, vector<8x1x128xf32>
    %50 = vector.shape_cast %49 : vector<8x1x128xf32> to vector<8x128xf32>
    %51 = vector.shape_cast %48 : vector<8x128xf32> to vector<8x1x128xf32>
    tpu.vector_store %arg6[%c0_26, %c2_27, %c0_28], %51 {strides = array<i32>} : memref<8x8x128xf32, #tpu.memory_space<vmem>>, vector<8x1x128xf32>,
    %52 = arith.addf %35, %48 : vector<8x128xf32>
    %c0_29 = arith.constant 0 : index
    %c3 = arith.constant 3 : index
    %53 = vector.load %arg2[%c0_29, %c3] : memref<8x8xf32, #tpu.memory_space<vmem>>, vector<8x1xf32>
    %c3_30 = arith.constant 3 : index
    %c0_31 = arith.constant 0 : index
    %54 = vector.load %arg3[%c3_30, %c0_31] : memref<8x128xf32, #tpu.memory_space<vmem>>, vector<1x128xf32>
    %55 = vector.broadcast %53 : vector<8x1xf32> to vector<8x128xf32>
    %56 = vector.broadcast %54 : vector<1x128xf32> to vector<8x128xf32>
    %57 = arith.addf %55, %56 : vector<8x128xf32>
    %58 = tpu.reciprocal %57 {approx = true} : vector<8x128xf32> -> vector<8x128xf32>
    %59 = arith.mulf %57, %58 : vector<8x128xf32>
    %cst_32 = arith.constant 2.000000e+00 : f32
    %60 = vector.broadcast %cst_32 : f32 to vector<8x128xf32>
    %61 = arith.subf %60, %59 : vector<8x128xf32>
    %62 = arith.mulf %58, %61 : vector<8x128xf32>
    %c0_33 = arith.constant 0 : index
    %c3_34 = arith.constant 3 : index
    %63 = vector.load %arg1[%c0_33, %c3_34] : memref<8x8xf32, #tpu.memory_space<vmem>>, vector<8x1xf32>
    %64 = vector.broadcast %63 : vector<8x1xf32> to vector<8x128xf32>
    %65 = arith.mulf %64, %62 : vector<8x128xf32>
    %c0_35 = arith.constant 0 : index
    %c3_36 = arith.constant 3 : index
    %c0_37 = arith.constant 0 : index
    %66 = vector.load %arg6[%c0_35, %c3_36, %c0_37] : memref<8x8x128xf32, #tpu.memory_space<vmem>>, vector<8x1x128xf32>
    %67 = vector.shape_cast %66 : vector<8x1x128xf32> to vector<8x128xf32>
    %68 = vector.shape_cast %65 : vector<8x128xf32> to vector<8x1x128xf32>
    tpu.vector_store %arg6[%c0_35, %c3_36, %c0_37], %68 {strides = array<i32>} : memref<8x8x128xf32, #tpu.memory_space<vmem>>, vector<8x1x128xf32>,
    %69 = arith.addf %52, %65 : vector<8x128xf32>
    %c0_38 = arith.constant 0 : index
    %c4 = arith.constant 4 : index
    %70 = vector.load %arg2[%c0_38, %c4] : memref<8x8xf32, #tpu.memory_space<vmem>>, vector<8x1xf32>
    %c4_39 = arith.constant 4 : index
    %c0_40 = arith.constant 0 : index
    %71 = vector.load %arg3[%c4_39, %c0_40] : memref<8x128xf32, #tpu.memory_space<vmem>>, vector<1x128xf32>
    %72 = vector.broadcast %70 : vector<8x1xf32> to vector<8x128xf32>
    %73 = vector.broadcast %71 : vector<1x128xf32> to vector<8x128xf32>
    %74 = arith.addf %72, %73 : vector<8x128xf32>
    %75 = tpu.reciprocal %74 {approx = true} : vector<8x128xf32> -> vector<8x128xf32>
    %76 = arith.mulf %74, %75 : vector<8x128xf32>
    %cst_41 = arith.constant 2.000000e+00 : f32
    %77 = vector.broadcast %cst_41 : f32 to vector<8x128xf32>
    %78 = arith.subf %77, %76 : vector<8x128xf32>
    %79 = arith.mulf %75, %78 : vector<8x128xf32>
    %c0_42 = arith.constant 0 : index
    %c4_43 = arith.constant 4 : index
    %80 = vector.load %arg1[%c0_42, %c4_43] : memref<8x8xf32, #tpu.memory_space<vmem>>, vector<8x1xf32>
    %81 = vector.broadcast %80 : vector<8x1xf32> to vector<8x128xf32>
    %82 = arith.mulf %81, %79 : vector<8x128xf32>
    %c0_44 = arith.constant 0 : index
    %c4_45 = arith.constant 4 : index
    %c0_46 = arith.constant 0 : index
    %83 = vector.load %arg6[%c0_44, %c4_45, %c0_46] : memref<8x8x128xf32, #tpu.memory_space<vmem>>, vector<8x1x128xf32>
    %84 = vector.shape_cast %83 : vector<8x1x128xf32> to vector<8x128xf32>
    %85 = vector.shape_cast %82 : vector<8x128xf32> to vector<8x1x128xf32>
    tpu.vector_store %arg6[%c0_44, %c4_45, %c0_46], %85 {strides = array<i32>} : memref<8x8x128xf32, #tpu.memory_space<vmem>>, vector<8x1x128xf32>,
    %86 = arith.addf %69, %82 : vector<8x128xf32>
    %c0_47 = arith.constant 0 : index
    %c5 = arith.constant 5 : index
    %87 = vector.load %arg2[%c0_47, %c5] : memref<8x8xf32, #tpu.memory_space<vmem>>, vector<8x1xf32>
    %c5_48 = arith.constant 5 : index
    %c0_49 = arith.constant 0 : index
    %88 = vector.load %arg3[%c5_48, %c0_49] : memref<8x128xf32, #tpu.memory_space<vmem>>, vector<1x128xf32>
    %89 = vector.broadcast %87 : vector<8x1xf32> to vector<8x128xf32>
    %90 = vector.broadcast %88 : vector<1x128xf32> to vector<8x128xf32>
    %91 = arith.addf %89, %90 : vector<8x128xf32>
    %92 = tpu.reciprocal %91 {approx = true} : vector<8x128xf32> -> vector<8x128xf32>
    %93 = arith.mulf %91, %92 : vector<8x128xf32>
    %cst_50 = arith.constant 2.000000e+00 : f32
    %94 = vector.broadcast %cst_50 : f32 to vector<8x128xf32>
    %95 = arith.subf %94, %93 : vector<8x128xf32>
    %96 = arith.mulf %92, %95 : vector<8x128xf32>
    %c0_51 = arith.constant 0 : index
    %c5_52 = arith.constant 5 : index
    %97 = vector.load %arg1[%c0_51, %c5_52] : memref<8x8xf32, #tpu.memory_space<vmem>>, vector<8x1xf32>
    %98 = vector.broadcast %97 : vector<8x1xf32> to vector<8x128xf32>
    %99 = arith.mulf %98, %96 : vector<8x128xf32>
    %c0_53 = arith.constant 0 : index
    %c5_54 = arith.constant 5 : index
    %c0_55 = arith.constant 0 : index
    %100 = vector.load %arg6[%c0_53, %c5_54, %c0_55] : memref<8x8x128xf32, #tpu.memory_space<vmem>>, vector<8x1x128xf32>
    %101 = vector.shape_cast %100 : vector<8x1x128xf32> to vector<8x128xf32>
    %102 = vector.shape_cast %99 : vector<8x128xf32> to vector<8x1x128xf32>
    tpu.vector_store %arg6[%c0_53, %c5_54, %c0_55], %102 {strides = array<i32>} : memref<8x8x128xf32, #tpu.memory_space<vmem>>, vector<8x1x128xf32>,
    %103 = arith.addf %86, %99 : vector<8x128xf32>
    %c0_56 = arith.constant 0 : index
    %c6 = arith.constant 6 : index
    %104 = vector.load %arg2[%c0_56, %c6] : memref<8x8xf32, #tpu.memory_space<vmem>>, vector<8x1xf32>
    %c6_57 = arith.constant 6 : index
    %c0_58 = arith.constant 0 : index
    %105 = vector.load %arg3[%c6_57, %c0_58] : memref<8x128xf32, #tpu.memory_space<vmem>>, vector<1x128xf32>
    %106 = vector.broadcast %104 : vector<8x1xf32> to vector<8x128xf32>
    %107 = vector.broadcast %105 : vector<1x128xf32> to vector<8x128xf32>
    %108 = arith.addf %106, %107 : vector<8x128xf32>
    %109 = tpu.reciprocal %108 {approx = true} : vector<8x128xf32> -> vector<8x128xf32>
    %110 = arith.mulf %108, %109 : vector<8x128xf32>
    %cst_59 = arith.constant 2.000000e+00 : f32
    %111 = vector.broadcast %cst_59 : f32 to vector<8x128xf32>
    %112 = arith.subf %111, %110 : vector<8x128xf32>
    %113 = arith.mulf %109, %112 : vector<8x128xf32>
    %c0_60 = arith.constant 0 : index
    %c6_61 = arith.constant 6 : index
    %114 = vector.load %arg1[%c0_60, %c6_61] : memref<8x8xf32, #tpu.memory_space<vmem>>, vector<8x1xf32>
    %115 = vector.broadcast %114 : vector<8x1xf32> to vector<8x128xf32>
    %116 = arith.mulf %115, %113 : vector<8x128xf32>
    %c0_62 = arith.constant 0 : index
    %c6_63 = arith.constant 6 : index
    %c0_64 = arith.constant 0 : index
    %117 = vector.load %arg6[%c0_62, %c6_63, %c0_64] : memref<8x8x128xf32, #tpu.memory_space<vmem>>, vector<8x1x128xf32>
    %118 = vector.shape_cast %117 : vector<8x1x128xf32> to vector<8x128xf32>
    %119 = vector.shape_cast %116 : vector<8x128xf32> to vector<8x1x128xf32>
    tpu.vector_store %arg6[%c0_62, %c6_63, %c0_64], %119 {strides = array<i32>} : memref<8x8x128xf32, #tpu.memory_space<vmem>>, vector<8x1x128xf32>,
    %120 = arith.addf %103, %116 : vector<8x128xf32>
    %c0_65 = arith.constant 0 : index
    %c7 = arith.constant 7 : index
    %121 = vector.load %arg2[%c0_65, %c7] : memref<8x8xf32, #tpu.memory_space<vmem>>, vector<8x1xf32>
    %c7_66 = arith.constant 7 : index
    %c0_67 = arith.constant 0 : index
    %122 = vector.load %arg3[%c7_66, %c0_67] : memref<8x128xf32, #tpu.memory_space<vmem>>, vector<1x128xf32>
    %123 = vector.broadcast %121 : vector<8x1xf32> to vector<8x128xf32>
    %124 = vector.broadcast %122 : vector<1x128xf32> to vector<8x128xf32>
    %125 = arith.addf %123, %124 : vector<8x128xf32>
    %126 = tpu.reciprocal %125 {approx = true} : vector<8x128xf32> -> vector<8x128xf32>
    %127 = arith.mulf %125, %126 : vector<8x128xf32>
    %cst_68 = arith.constant 2.000000e+00 : f32
    %128 = vector.broadcast %cst_68 : f32 to vector<8x128xf32>
    %129 = arith.subf %128, %127 : vector<8x128xf32>
    %130 = arith.mulf %126, %129 : vector<8x128xf32>
    %c0_69 = arith.constant 0 : index
    %c7_70 = arith.constant 7 : index
    %131 = vector.load %arg1[%c0_69, %c7_70] : memref<8x8xf32, #tpu.memory_space<vmem>>, vector<8x1xf32>
    %132 = vector.broadcast %131 : vector<8x1xf32> to vector<8x128xf32>
    %133 = arith.mulf %132, %130 : vector<8x128xf32>
    %c0_71 = arith.constant 0 : index
    %c7_72 = arith.constant 7 : index
    %c0_73 = arith.constant 0 : index
    %134 = vector.load %arg6[%c0_71, %c7_72, %c0_73] : memref<8x8x128xf32, #tpu.memory_space<vmem>>, vector<8x1x128xf32>
    %135 = vector.shape_cast %134 : vector<8x1x128xf32> to vector<8x128xf32>
    %136 = vector.shape_cast %133 : vector<8x128xf32> to vector<8x1x128xf32>
    tpu.vector_store %arg6[%c0_71, %c7_72, %c0_73], %136 {strides = array<i32>} : memref<8x8x128xf32, #tpu.memory_space<vmem>>, vector<8x1x128xf32>,
    %137 = arith.addf %120, %133 : vector<8x128xf32>
    %138 = vector.broadcast %0 : f32 to vector<8x128xf32>
    %139 = arith.addf %137, %138 : vector<8x128xf32>
    %c0_74 = arith.constant 0 : index
    %c0_75 = arith.constant 0 : index
    %140 = vector.load %arg5[%c0_74, %c0_75] : memref<8x128xf32, #tpu.memory_space<vmem>>, vector<8x128xf32>
    tpu.vector_store %arg5[%c0_74, %c0_75], %139 {strides = array<i32>} : memref<8x128xf32, #tpu.memory_space<vmem>>, vector<8x128xf32>,
    return
  }
  func.func @transform_0(%arg0: i32) -> (i32, i32) {
    %c0_i32 = arith.constant 0 : i32
    %c0_i32_0 = arith.constant 0 : i32
    return %arg0, %c0_i32 : i32, i32
  }
  func.func @transform_1(%arg0: i32) -> (i32, i32) {
    %c0_i32 = arith.constant 0 : i32
    %c0_i32_0 = arith.constant 0 : i32
    return %arg0, %c0_i32 : i32, i32
  }
  func.func @transform_2(%arg0: i32) -> (i32, i32) {
    %c0_i32 = arith.constant 0 : i32
    %c0_i32_0 = arith.constant 0 : i32
    %c0_i32_1 = arith.constant 0 : i32
    return %c0_i32, %c0_i32_0 : i32, i32
  }
  func.func @transform_3(%arg0: i32) -> (i32, i32) {
    %c0_i32 = arith.constant 0 : i32
    %c0_i32_0 = arith.constant 0 : i32
    %c0_i32_1 = arith.constant 0 : i32
    return %c0_i32, %c0_i32_0 : i32, i32
  }
  func.func @transform_4(%arg0: i32) -> (i32, i32) {
    %c0_i32 = arith.constant 0 : i32
    %c0_i32_0 = arith.constant 0 : i32
    return %arg0, %c0_i32 : i32, i32
  }
  func.func @transform_5(%arg0: i32) -> (i32, i32, i32) {
    %c0_i32 = arith.constant 0 : i32
    %c0_i32_0 = arith.constant 0 : i32
    %c0_i32_1 = arith.constant 0 : i32
    return %arg0, %c0_i32, %c0_i32_0 : i32, i32, i32
  }
}

</mosaic_0001>

<bundles_post_ra>
// kernel: tpu_custom_call.1
= control target key start
LH: loop header
LB: loop body
LE: loop exit
PB: predicated region body
PF: predicated region fallthrough
CT: control target
= control target key end

     0   :  { %12 = vsyncpa [#allocation4], 0  ;;  %s1171_s0 = inlined_call_operand.hbm [shape: f32[8,8], index: 0, kind: input, shape index: {}]   ;;  %s1172_s1 = inlined_call_operand.hbm [shape: f32[8,8], index: 1, kind: input, shape index: {}]   ;;  %s1173_s2 = inlined_call_operand.hbm [shape: f32[8,128], index: 2, kind: input, shape index: {}]   ;;  %s1174_s3 = inlined_call_operand.<no memory space> [shape: f32[1,1], index: 3, kind: input, shape index: {}]   ;;  %s1175_s4 = inlined_call_operand.hbm [shape: f32[8,128], index: 4, kind: output, shape index: {0}]   ;;  %s1176_s5 = inlined_call_operand.hbm [shape: f32[8,8,128], index: 5, kind: output, shape index: {1}]  }
   0x1   :  { %13 = vsyncpa [#allocation7], 0 }
   0x2   :  { %14 = vsyncpa [#allocation5], 0 }
   0x3   :  { %15 = vsyncpa [#allocation11], 0  ;;  %s1010_s18 = smov [#allocation6]   ;;  %s1011_s20 = smov [#allocation3]  }
   0x4   :  { %s32_s19 = sshll.u32 %s1010_s18, 4  ;;  %s22_s21 = sshll.u32 %s1011_s20, 4  ;;  %s33_s19 = int_to_ptr.vmem [resolvable:$true] %s32_s19  ;;  %s23_s21 = int_to_ptr.vmem [resolvable:$true] %s22_s21 }
   0x5   :  { %s910_s22 = scalar_lea.vmem %s33_s19, 128  ;;  %p915_p1 = scmp.lt.s32.totalorder %s33_s19, %s33_s19 }
   0x6   :  { %p911_p0 = scmp.ne.s32.totalorder %s33_s19, %s910_s22  ;;  %p916_p2 = scmp.lt.s32.totalorder %s910_s22, %s910_s22 }
   0x8   :  { %p917_p3 = por %p916_p2, %p915_p1 }
   0xa   :  { %p918_p4 = pnand %p917_p3, %p911_p0 }
   0xc   :  { %921 = shalt.err (!%p918_p4)
}
   0xd   :  { %35 = dma.hbm_to_vmem [thread:$0]  %s1172_s1, 128, %s33_s19, [#allocation7]  }
   0xe   :  { %s930_s25 = scalar_lea.vmem %s23_s21, 128  ;;  %p935_p6 = scmp.lt.s32.totalorder %s23_s21, %s23_s21 }
   0xf   :  { %p931_p5 = scmp.ne.s32.totalorder %s23_s21, %s930_s25  ;;  %p936_p7 = scmp.lt.s32.totalorder %s930_s25, %s930_s25 }
  0x11   :  { %p937_p8 = por %p936_p7, %p935_p6 }
  0x13   :  { %p938_p9 = pnand %p937_p8, %p931_p5 }
  0x15   :  { %941 = shalt.err (!%p938_p9)
}
  0x16   :  { %25 = dma.hbm_to_vmem [thread:$0]  %s1171_s0, 128, %s23_s21, [#allocation4]  }
  0x17   :  { %s1012_s28 = smov [#allocation8]  }
  0x18   :  { %s42_s29 = sshll.u32 %s1012_s28, 4  ;;  %s43_s29 = int_to_ptr.vmem [resolvable:$true] %s42_s29 }
  0x19   :  { %s950_s30 = scalar_lea.vmem %s43_s29, 128  ;;  %p955_p11 = scmp.lt.s32.totalorder %s43_s29, %s43_s29 }
  0x1a   :  { %p951_p10 = scmp.ne.s32.totalorder %s43_s29, %s950_s30  ;;  %p956_p12 = scmp.lt.s32.totalorder %s950_s30, %s950_s30 }
  0x1c   :  { %p957_p13 = por %p956_p12, %p955_p11 }
  0x1e   :  { %p958_p0 = pnand %p957_p13, %p951_p10 }
  0x20   :  { %961 = shalt.err (!%p958_p0)
}
  0x21   :  { %45 = dma.hbm_to_vmem [thread:$0]  %s1173_s2, 128, %s43_s29, [#allocation7]  }
  0x22   :  { %1002 = dma.done.wait [#allocation4], 128  }
  0x23   :  { %1003 = vsyncadd [#allocation4], 4294967168 }
  0x24   :  { %1004 = dma.done.wait [#allocation7], 256  }
  0x25   :  { %1005 = vsyncadd [#allocation7], 4294967040  ;;  %v1013_v0 = vmov 2   ;;  %v1014_v1 = vmov 0   ;;  %v238_v2 = vld [vmem:[#allocation6] sm:$0xff]  ;;  %v1015_v3 = vmov 3   ;;  %v86_v31 = vlaneseq }
  0x26   :  { %871 = vset.pattern.permute.xlu1 %v1013_v0  ;;  %869 = vset.pattern.permute.xlu0 %v1014_v1  ;;  %v1016_v4 = vmov 1   ;;  %v1017_v5 = vmov 4   ;;  %v1018_v6 = vmov 5   ;;  %v74_v7 = vld [vmem:[#allocation3] sm:$0xff]  ;;  %v1019_v8 = vmov 6   ;;  %s1022_s7 = smov [#allocation9]  }
  0x27   :  { %242 = vperm.xlu1 %871, %v238_v2   ;;  %62 = vperm.xlu0 %869, %v238_v2   ;;  %v1020_v9 = vmov 7   ;;  %v823_v10 = vld [vmem:[#allocation8 + $0x2] ss:$0 sm:$0xff]  ;;  %v813_v11 = vld [vmem:[#allocation8] ss:$0 sm:$0xff]  ;;  %v87_v39 = vshrl.u32 %v86_v31, 7 }
  0x28   :  { %v828_v16 = vld [vmem:[#allocation8 + $0x3] ss:$0 sm:$0xff]  ;;  %v818_v17 = vld [vmem:[#allocation8 + $0x1] ss:$0 sm:$0xff]  ;;  %v833_v22 = vld [vmem:[#allocation8 + $0x4] ss:$0 sm:$0xff] }
  0x29   :  { %v838_v23 = vld [vmem:[#allocation8 + $0x5] ss:$0 sm:$0xff]  ;;  %v843_v28 = vld [vmem:[#allocation8 + $0x6] ss:$0 sm:$0xff]  ;;  %v1021_v29 = vmov 1966171168  }
  0x2a   :  { %v84_v30 = vunpack.c.l.s4 %v1021_v29  ;;  %v848_v37 = vld [vmem:[#allocation8 + $0x7] ss:$0 sm:$0xff]  ;;  %s787_s8 = sshll.u32 %s1022_s7, 4  ;;  %s1023_s9 = smov [#allocation10]   ;;  %s788_s8 = int_to_ptr.vmem [resolvable:$true] %s787_s8 }
  0x2b   :  { %872 = vset.pattern.permute.xlu1 %v1015_v3  ;;  %870 = vset.pattern.permute.xlu0 %v1016_v4  ;;  %s796_s10 = sshll.u32 %s1023_s9, 4  ;;  %p967_p2 = scmp.lt.s32.totalorder %s788_s8, %s788_s8  ;;  %s797_s10 = int_to_ptr.vmem [resolvable:$true] %s796_s10 }
  0x2c   :  { %332 = vperm.xlu1 %872, %v238_v2   ;;  %152 = vperm.xlu0 %870, %v238_v2   ;;  %v85_v38 = vunpack.c.0.s8 %v84_v30 }
  0x2e   :  { %v1067_v49 = vsub.s32 %v85_v38, %v87_v39 }
  0x30   :  { %873 = vset.pattern.permute.xlu1 %v1017_v5  ;;  %874 = vset.pattern.permute.xlu0 %v1018_v6 }
  0x31   :  { %422 = vperm.xlu1 %873, %v238_v2   ;;  %512 = vperm.xlu0 %874, %v238_v2  }
  0x35   :  { %875 = vset.pattern.permute.xlu1 %v1019_v8  ;;  %877 = vset.pattern.permute.xlu0 %v1014_v1 }
  0x36   :  { %602 = vperm.xlu1 %875, %v238_v2   ;;  %77 = vperm.xlu0 %877, %v74_v7  }
  0x3a   :  { %876 = vset.pattern.permute.xlu1 %v1020_v9  ;;  %880 = vset.pattern.permute.xlu0 %v1015_v3 }
  0x3b   :  { %692 = vperm.xlu1 %876, %v238_v2   ;;  %347 = vperm.xlu0 %880, %v74_v7  }
  0x3f   :  { %878 = vset.pattern.permute.xlu1 %v1016_v4  ;;  %883 = vset.pattern.permute.xlu0 %v1019_v8 }
  0x40   :  { %167 = vperm.xlu1 %878, %v74_v7   ;;  %617 = vperm.xlu0 %883, %v74_v7  }
  0x44   :  { %879 = vset.pattern.permute.xlu1 %v1013_v0  ;;  %885 = vset.pattern.permute.xlu0 %v1020_v9 }
  0x45   :  { %257 = vperm.xlu1 %879, %v74_v7  }
  0x49   :  { %881 = vset.pattern.permute.xlu1 %v1017_v5 }
  0x4a   :  { %437 = vperm.xlu1 %881, %v74_v7  }
  0x4e   :  { %882 = vset.pattern.permute.xlu1 %v1018_v6 }
  0x4f   :  { %527 = vperm.xlu1 %882, %v74_v7  }
  0x53   :  { %884 = vset.pattern.permute.xlu1 %v1020_v9 }
  0x54   :  { %707 = vperm.xlu1 %884, %v74_v7  }
  0xa2   :  { %v243_v12 = vpop.permute.xlu1 %242  ;;  %v63_v13 = vpop.permute.xlu0 %62 }
  0xa3   :  { %v249_v14 = vadd.f32 %v823_v10, %v243_v12  ;;  %v69_v15 = vadd.f32 %v813_v11, %v63_v13 }
  0xa5   :  { %886 = vrcp.f32 %v69_v15 }
  0xa6   :  { %888 = vrcp.f32 %v249_v14 }
  0xa7   :  { %v333_v18 = vpop.permute.xlu1 %332  ;;  %v153_v19 = vpop.permute.xlu0 %152 }
  0xa8   :  { %v339_v20 = vadd.f32 %v828_v16, %v333_v18  ;;  %v159_v21 = vadd.f32 %v818_v17, %v153_v19 }
  0xaa   :  { %890 = vrcp.f32 %v339_v20 }
  0xab   :  { %892 = vrcp.f32 %v159_v21 }
  0xac   :  { %v423_v24 = vpop.permute.xlu1 %422  ;;  %v513_v25 = vpop.permute.xlu0 %512 }
  0xad   :  { %v429_v26 = vadd.f32 %v833_v22, %v423_v24  ;;  %v519_v27 = vadd.f32 %v838_v23, %v513_v25 }
  0xaf   :  { %894 = vrcp.f32 %v429_v26 }
  0xb0   :  { %896 = vrcp.f32 %v519_v27 }
  0xb1   :  { %v603_v32 = vpop.permute.xlu1 %602  ;;  %v78_v42 = vpop.permute.xlu0 %77 }
  0xb2   :  { %v609_v33 = vadd.f32 %v843_v28, %v603_v32  ;;  %v887_v34 = vpop.eup %886 }
  0xb3   :  { %v889_v35 = vpop.eup %888  ;;  %v71_v36 = vmul.f32 %v887_v34, %v69_v15 }
  0xb4   :  { %898 = vrcp.f32 %v609_v33  ;;  %v251_v44 = vmul.f32 %v889_v35, %v249_v14 }
  0xb5   :  { %v72_v40 = vsub.f32 2.0, %v71_v36 }
  0xb6   :  { %v693_v41 = vpop.permute.xlu1 %692  ;;  %v252_v53 = vsub.f32 2.0, %v251_v44  ;;  %v348_v60 = vpop.permute.xlu0 %347 }
  0xb7   :  { %v891_v43 = vpop.eup %890  ;;  %v1065_v45 = vadd.f32 %v848_v37, %v693_v41  ;;  %v73_v48 = vmul.f32 %v887_v34, %v72_v40 }
  0xb8   :  { %v893_v46 = vpop.eup %892  ;;  %v341_v47 = vmul.f32 %v891_v43, %v339_v20  ;;  %v253_v7 = vmul.f32 %v889_v35, %v252_v53 }
  0xb9   :  { %v161_v50 = vmul.f32 %v893_v46, %v159_v21  ;;  %900 = vrcp.f32 %v1065_v45  ;;  %v80_v52 = vmul.f32 %v78_v42, %v73_v48 }
  0xba   :  { %v342_v51 = vsub.f32 2.0, %v341_v47 }
  0xbb   :  { %v162_v54 = vsub.f32 2.0, %v161_v50  ;;  %v168_v55 = vpop.permute.xlu1 %167  ;;  %v82_v57 = vcombine.high %v80_v52, %v80_v52  ;;  %v89_v58 = vrot.slane %v80_v52, %v1067_v49 }
  0xbc   :  { %v1070_v56 = vpop.eup %894  ;;  %v343_v59 = vmul.f32 %v891_v43, %v342_v51 }
  0xbd   :  { %v1073_v61 = vpop.eup %896  ;;  %v1076_v62 = vmul.f32 %v1070_v56, %v429_v26  ;;  %v163_v63 = vmul.f32 %v893_v46, %v162_v54  ;;  %v96_v1 = vrot.slane %v82_v57, %v1067_v49  ;;  %v97_v2 = vcombine.high %v89_v58, %v89_v58  ;;  %814 = vst.sshfl [vmem:[#allocation10] sm:$0x1 pattern:$0x73625140] %v89_v58 }
  0xbe   :  { %v1079_v0 = vmul.f32 %v1073_v61, %v519_v27  ;;  %v105_v3 = vrot.slane %v89_v58, %v1067_v49  ;;  %v1084_v6 = vmul.f32 %v348_v60, %v343_v59 }
  0xbf   :  { %v432_v4 = vsub.f32 2.0, %v1076_v62  ;;  %v170_v5 = vmul.f32 %v168_v55, %v163_v63  ;;  %v98_v9 = vcombine.high %v96_v1, %v96_v1  ;;  %v112_v10 = vrot.slane %v96_v1, %v1067_v49  ;;  %815 = vst.sshfl [vmem:[#allocation10 + $0x8] sm:$0x1 pattern:$0x73625140] %v97_v2 }
  0xc0   :  { %v522_v8 = vsub.f32 2.0, %v1079_v0  ;;  %v119_v11 = vrot.slane %v97_v2, %v1067_v49  ;;  %816 = vst.sshfl [vmem:[#allocation10 + $0x20] sm:$0x1 pattern:$0x73625140] %v96_v1  ;;  %v258_v12 = vpop.permute.xlu1 %257  ;;  %v127_v14 = vcombine.high %v105_v3, %v105_v3  ;;  %v352_v25 = vcombine.high %v1084_v6, %v1084_v6  ;;  %v618_v2 = vpop.permute.xlu0 %617 }
  0xc1   :  { %v1089_v13 = vpop.eup %898  ;;  %v172_v15 = vcombine.high %v170_v5, %v170_v5  ;;  %v179_v16 = vrot.slane %v170_v5, %v1067_v49  ;;  %v237_v17 = vadd.f32 %v170_v5, %v80_v52  ;;  %v126_v19 = vrot.slane %v98_v9, %v1067_v49  ;;  %817 = vst.sshfl [vmem:[#allocation10 + $0x28] sm:$0x1 pattern:$0x73625140] %v98_v9 }
  0xc2   :  { %v1093_v18 = vmul.f32 %v1089_v13, %v609_v33  ;;  %v128_v20 = vcombine.high %v112_v10, %v112_v10  ;;  %v129_v21 = vcombine.high %v119_v11, %v119_v11  ;;  %141 = vst [vmem:[#allocation10 + $0x10] sm:$0x1] %v127_v14  ;;  %v359_v28 = vrot.slane %v1084_v6, %v1067_v49 }
  0xc3   :  { %v186_v22 = vrot.slane %v172_v15, %v1067_v49  ;;  %v187_v23 = vcombine.high %v179_v16, %v179_v16  ;;  %v195_v24 = vrot.slane %v179_v16, %v1067_v49  ;;  %819 = vst.sshfl [vmem:[#allocation10 + $0x1] sm:$0x1 pattern:$0x73625140] %v179_v16  ;;  %v130_v27 = vcombine.high %v126_v19, %v126_v19 }
  0xc4   :  { %v612_v26 = vsub.f32 2.0, %v1093_v18  ;;  %142 = vst [vmem:[#allocation10 + $0x18] sm:$0x1] %v129_v21  ;;  %145 = vst [vmem:[#allocation10 + $0x30] sm:$0x1] %v128_v20  ;;  %v260_v29 = vmul.f32 %v258_v12, %v253_v7  ;;  %v366_v36 = vrot.slane %v352_v25, %v1067_v49  ;;  %v367_v37 = vcombine.high %v359_v28, %v359_v28 }
  0xc5   :  { %v188_v30 = vcombine.high %v186_v22, %v186_v22  ;;  %v202_v31 = vrot.slane %v186_v22, %v1067_v49  ;;  %v209_v32 = vrot.slane %v187_v23, %v1067_v49  ;;  %v217_v33 = vcombine.high %v195_v24, %v195_v24  ;;  %820 = vst.sshfl [vmem:[#allocation10 + $0x9] sm:$0x1 pattern:$0x73625140] %v187_v23  ;;  %v438_v34 = vpop.permute.xlu1 %437 }
  0xc6   :  { %821 = vst.sshfl [vmem:[#allocation10 + $0x21] sm:$0x1 pattern:$0x73625140] %v186_v22  ;;  %v901_v35 = vpop.eup %900  ;;  %146 = vst [vmem:[#allocation10 + $0x38] sm:$0x1] %v130_v27  ;;  %v375_v38 = vrot.slane %v359_v28, %v1067_v49  ;;  %v262_v39 = vcombine.high %v260_v29, %v260_v29  ;;  %v368_v44 = vcombine.high %v366_v36, %v366_v36 }
  0xc7   :  { %829 = vst.sshfl [vmem:[#allocation10 + $0x3] sm:$0x1 pattern:$0x73625140] %v359_v28  ;;  %v701_v40 = vmul.f32 %v901_v35, %v1065_v45  ;;  %v216_v41 = vrot.slane %v188_v30, %v1067_v49  ;;  %v218_v42 = vcombine.high %v202_v31, %v202_v31  ;;  %v219_v43 = vcombine.high %v209_v32, %v209_v32 }
  0xc8   :  { %231 = vst [vmem:[#allocation10 + $0x11] sm:$0x1] %v217_v33  ;;  %822 = vst.sshfl [vmem:[#allocation10 + $0x29] sm:$0x1 pattern:$0x73625140] %v188_v30  ;;  %v382_v46 = vrot.slane %v366_v36, %v1067_v49  ;;  %v389_v47 = vrot.slane %v367_v37, %v1067_v49  ;;  %v397_v48 = vcombine.high %v375_v38, %v375_v38 }
  0xc9   :  { %830 = vst.sshfl [vmem:[#allocation10 + $0xb] sm:$0x1 pattern:$0x73625140] %v367_v37  ;;  %v702_v50 = vsub.f32 2.0, %v701_v40  ;;  %v220_v51 = vcombine.high %v216_v41, %v216_v41  ;;  %v269_v45 = vrot.slane %v260_v29, %v1067_v49  ;;  %v276_v52 = vrot.slane %v262_v39, %v1067_v49 }
  0xca   :  { %831 = vst.sshfl [vmem:[#allocation10 + $0x23] sm:$0x1 pattern:$0x73625140] %v366_v36  ;;  %232 = vst [vmem:[#allocation10 + $0x19] sm:$0x1] %v219_v43  ;;  %v396_v53 = vrot.slane %v368_v44, %v1067_v49  ;;  %v398_v54 = vcombine.high %v382_v46, %v382_v46  ;;  %v399_v55 = vcombine.high %v389_v47, %v389_v47  ;;  %v528_v58 = vpop.permute.xlu1 %527 }
  0xcb   :  { %235 = vst [vmem:[#allocation10 + $0x31] sm:$0x1] %v218_v42  ;;  %411 = vst [vmem:[#allocation10 + $0x13] sm:$0x1] %v397_v48  ;;  %v327_v57 = vadd.f32 %v260_v29, %v237_v17  ;;  %v277_v59 = vcombine.high %v269_v45, %v269_v45  ;;  %v278_v60 = vcombine.high %v276_v52, %v276_v52 }
  0xcc   :  { %832 = vst.sshfl [vmem:[#allocation10 + $0x2b] sm:$0x1 pattern:$0x73625140] %v368_v44  ;;  %236 = vst [vmem:[#allocation10 + $0x39] sm:$0x1] %v220_v51  ;;  %v285_v63 = vrot.slane %v269_v45, %v1067_v49  ;;  %v292_v1 = vrot.slane %v276_v52, %v1067_v49  ;;  %v400_v3 = vcombine.high %v396_v53, %v396_v53 }
  0xcd   :  { %824 = vst.sshfl [vmem:[#allocation10 + $0x2] sm:$0x1 pattern:$0x73625140] %v269_v45  ;;  %412 = vst [vmem:[#allocation10 + $0x1b] sm:$0x1] %v399_v55  ;;  %v433_v5 = vmul.f32 %v1070_v56, %v432_v4  ;;  %v417_v7 = vadd.f32 %v1084_v6, %v327_v57  ;;  %v613_v9 = vmul.f32 %v1089_v13, %v612_v26 }
  0xce   :  { %826 = vst.sshfl [vmem:[#allocation10 + $0x22] sm:$0x1 pattern:$0x73625140] %v276_v52  ;;  %415 = vst [vmem:[#allocation10 + $0x33] sm:$0x1] %v398_v54  ;;  %v299_v10 = vrot.slane %v277_v59, %v1067_v49  ;;  %v306_v11 = vrot.slane %v278_v60, %v1067_v49  ;;  %v307_v12 = vcombine.high %v285_v63, %v285_v63 }
  0xcf   :  { %v308_v14 = vcombine.high %v292_v1, %v292_v1  ;;  %825 = vst.sshfl [vmem:[#allocation10 + $0xa] sm:$0x1 pattern:$0x73625140] %v277_v59  ;;  %416 = vst [vmem:[#allocation10 + $0x3b] sm:$0x1] %v400_v3  ;;  %v440_v15 = vmul.f32 %v438_v34, %v433_v5  ;;  %v1123_v16 = vmul.f32 %v618_v2, %v613_v9  ;;  %v708_v6 = vpop.permute.xlu1 %707  ;;  %v778_v5 = vstv %s1174_s3 }
  0xd0   :  { %827 = vst.sshfl [vmem:[#allocation10 + $0x2a] sm:$0x1 pattern:$0x73625140] %v278_v60  ;;  %v309_v17 = vcombine.high %v299_v10, %v299_v10  ;;  %v310_v62 = vcombine.high %v306_v11, %v306_v11  ;;  %321 = vst [vmem:[#allocation10 + $0x12] sm:$0x1] %v307_v12  ;;  %v523_v56 = vmul.f32 %v1073_v61, %v522_v8 }
  0xd1   :  { %325 = vst [vmem:[#allocation10 + $0x32] sm:$0x1] %v308_v14  ;;  %v703_v4 = vmul.f32 %v901_v35, %v702_v50  ;;  %v442_v13 = vcombine.high %v440_v15, %v440_v15  ;;  %v449_v18 = vrot.slane %v440_v15, %v1067_v49  ;;  %v622_v19 = vcombine.high %v1123_v16, %v1123_v16  ;;  %s962_s3 = scalar_lea.vmem %s788_s8, 128 }
  0xd2   :  { %322 = vst [vmem:[#allocation10 + $0x1a] sm:$0x1] %v309_v17  ;;  %326 = vst [vmem:[#allocation10 + $0x3a] sm:$0x1] %v310_v62  ;;  %v507_v20 = vadd.f32 %v440_v15, %v417_v7  ;;  %v629_v21 = vrot.slane %v1123_v16, %v1067_v49  ;;  %v530_v22 = vmul.f32 %v528_v58, %v523_v56  ;;  %p963_p1 = scmp.ne.s32.totalorder %s788_s8, %s962_s3  ;;  %p968_p3 = scmp.lt.s32.totalorder %s962_s3, %s962_s3 }
  0xd3   :  { %v1133_v23 = vmul.f32 %v708_v6, %v703_v4  ;;  %v456_v0 = vrot.slane %v442_v13, %v1067_v49  ;;  %v457_v61 = vcombine.high %v449_v18, %v449_v18  ;;  %v465_v8 = vrot.slane %v449_v18, %v1067_v49  ;;  %834 = vst.sshfl [vmem:[#allocation10 + $0x4] sm:$0x1 pattern:$0x73625140] %v449_v18 }
  0xd4   :  { %v636_v24 = vrot.slane %v622_v19, %v1067_v49  ;;  %v637_v25 = vcombine.high %v629_v21, %v629_v21  ;;  %v645_v26 = vrot.slane %v629_v21, %v1067_v49  ;;  %844 = vst.sshfl [vmem:[#allocation10 + $0x6] sm:$0x1 pattern:$0x73625140] %v629_v21  ;;  %v532_v27 = vcombine.high %v530_v22, %v530_v22  ;;  %p969_p4 = por %p968_p3, %p967_p2 }
  0xd5   :  { %v539_v28 = vrot.slane %v530_v22, %v1067_v49  ;;  %v458_v29 = vcombine.high %v456_v0, %v456_v0  ;;  %v472_v30 = vrot.slane %v456_v0, %v1067_v49  ;;  %v479_v31 = vrot.slane %v457_v61, %v1067_v49  ;;  %835 = vst.sshfl [vmem:[#allocation10 + $0xc] sm:$0x1 pattern:$0x73625140] %v457_v61 }
  0xd6   :  { %v487_v32 = vcombine.high %v465_v8, %v465_v8  ;;  %836 = vst.sshfl [vmem:[#allocation10 + $0x24] sm:$0x1 pattern:$0x73625140] %v456_v0  ;;  %v638_v33 = vcombine.high %v636_v24, %v636_v24  ;;  %v652_v34 = vrot.slane %v636_v24, %v1067_v49  ;;  %v659_v35 = vrot.slane %v637_v25, %v1067_v49  ;;  %p970_p5 = pnand %p969_p4, %p963_p1 }
  0xd7   :  { %846 = vst.sshfl [vmem:[#allocation10 + $0x26] sm:$0x1 pattern:$0x73625140] %v636_v24  ;;  %v667_v36 = vcombine.high %v645_v26, %v645_v26  ;;  %v486_v37 = vrot.slane %v458_v29, %v1067_v49  ;;  %v488_v38 = vcombine.high %v472_v30, %v472_v30  ;;  %v489_v39 = vcombine.high %v479_v31, %v479_v31 }
  0xd8   :  { %845 = vst.sshfl [vmem:[#allocation10 + $0xe] sm:$0x1 pattern:$0x73625140] %v637_v25  ;;  %501 = vst [vmem:[#allocation10 + $0x14] sm:$0x1] %v487_v32  ;;  %v546_v40 = vrot.slane %v532_v27, %v1067_v49  ;;  %v666_v41 = vrot.slane %v638_v33, %v1067_v49  ;;  %v668_v42 = vcombine.high %v652_v34, %v652_v34 }
  0xd9   :  { %839 = vst.sshfl [vmem:[#allocation10 + $0x5] sm:$0x1 pattern:$0x73625140] %v539_v28  ;;  %v669_v43 = vcombine.high %v659_v35, %v659_v35  ;;  %681 = vst [vmem:[#allocation10 + $0x16] sm:$0x1] %v667_v36  ;;  %v547_v44 = vcombine.high %v539_v28, %v539_v28  ;;  %v490_v46 = vcombine.high %v486_v37, %v486_v37 }
  0xda   :  { %837 = vst.sshfl [vmem:[#allocation10 + $0x2c] sm:$0x1 pattern:$0x73625140] %v458_v29  ;;  %502 = vst [vmem:[#allocation10 + $0x1c] sm:$0x1] %v489_v39  ;;  %v548_v47 = vcombine.high %v546_v40, %v546_v40  ;;  %v555_v48 = vrot.slane %v539_v28, %v1067_v49  ;;  %v562_v50 = vrot.slane %v546_v40, %v1067_v49 }
  0xdb   :  { %847 = vst.sshfl [vmem:[#allocation10 + $0x2e] sm:$0x1 pattern:$0x73625140] %v638_v33  ;;  %505 = vst [vmem:[#allocation10 + $0x34] sm:$0x1] %v488_v38  ;;  %v670_v51 = vcombine.high %v666_v41, %v666_v41  ;;  %v569_v45 = vrot.slane %v547_v44, %v1067_v49  ;;  %v597_v52 = vadd.f32 %v530_v22, %v507_v20 }
  0xdc   :  { %841 = vst.sshfl [vmem:[#allocation10 + $0x25] sm:$0x1 pattern:$0x73625140] %v546_v40  ;;  %682 = vst [vmem:[#allocation10 + $0x1e] sm:$0x1] %v669_v43  ;;  %v712_v53 = vcombine.high %v1133_v23, %v1133_v23  ;;  %v576_v54 = vrot.slane %v548_v47, %v1067_v49  ;;  %v577_v55 = vcombine.high %v555_v48, %v555_v48 }
  0xdd   :  { %685 = vst [vmem:[#allocation10 + $0x36] sm:$0x1] %v668_v42  ;;  %840 = vst.sshfl [vmem:[#allocation10 + $0xd] sm:$0x1 pattern:$0x73625140] %v547_v44  ;;  %v578_v57 = vcombine.high %v562_v50, %v562_v50  ;;  %v719_v58 = vrot.slane %v1133_v23, %v1067_v49  ;;  %v579_v59 = vcombine.high %v569_v45, %v569_v45 }
  0xde   :  { %506 = vst [vmem:[#allocation10 + $0x3c] sm:$0x1] %v490_v46  ;;  %842 = vst.sshfl [vmem:[#allocation10 + $0x2d] sm:$0x1 pattern:$0x73625140] %v548_v47  ;;  %v687_v60 = vadd.f32 %v1123_v16, %v597_v52  ;;  %v726_v63 = vrot.slane %v712_v53, %v1067_v49  ;;  %v580_v1 = vcombine.high %v576_v54, %v576_v54 }
  0xdf   :  { %686 = vst [vmem:[#allocation10 + $0x3e] sm:$0x1] %v670_v51  ;;  %591 = vst [vmem:[#allocation10 + $0x15] sm:$0x1] %v577_v55  ;;  %v727_v2 = vcombine.high %v719_v58, %v719_v58  ;;  %v735_v3 = vrot.slane %v719_v58, %v1067_v49 }
  0xe0   :  { %595 = vst [vmem:[#allocation10 + $0x35] sm:$0x1] %v578_v57  ;;  %849 = vst.sshfl [vmem:[#allocation10 + $0x7] sm:$0x1 pattern:$0x73625140] %v719_v58  ;;  %v728_v7 = vcombine.high %v726_v63, %v726_v63  ;;  %v742_v9 = vrot.slane %v726_v63, %v1067_v49  ;;  %v777_v10 = vadd.f32 %v1133_v23, %v687_v60 }
  0xe1   :  { %592 = vst [vmem:[#allocation10 + $0x1d] sm:$0x1] %v579_v59  ;;  %851 = vst.sshfl [vmem:[#allocation10 + $0x27] sm:$0x1 pattern:$0x73625140] %v726_v63  ;;  %v749_v11 = vrot.slane %v727_v2, %v1067_v49  ;;  %v757_v12 = vcombine.high %v735_v3, %v735_v3 }
  0xe2   :  { %596 = vst [vmem:[#allocation10 + $0x3d] sm:$0x1] %v580_v1  ;;  %850 = vst.sshfl [vmem:[#allocation10 + $0xf] sm:$0x1 pattern:$0x73625140] %v727_v2  ;;  %v756_v14 = vrot.slane %v728_v7, %v1067_v49  ;;  %v758_v15 = vcombine.high %v742_v9, %v742_v9  ;;  %v779_v16 = vadd.f32 %v778_v5, %v777_v10 }
  0xe3   :  { %852 = vst.sshfl [vmem:[#allocation10 + $0x2f] sm:$0x1 pattern:$0x73625140] %v728_v7  ;;  %v759_v17 = vcombine.high %v749_v11, %v749_v11  ;;  %771 = vst [vmem:[#allocation10 + $0x17] sm:$0x1] %v757_v12 }
  0xe4   :  { %v760_v62 = vcombine.high %v756_v14, %v756_v14  ;;  %775 = vst [vmem:[#allocation10 + $0x37] sm:$0x1] %v758_v15  ;;  %780 = vst [vmem:[#allocation9] sm:$0xff] %v779_v16 }
  0xe5   :  { %772 = vst [vmem:[#allocation10 + $0x1f] sm:$0x1] %v759_v17 }
  0xe6   :  { %973 = shalt.err (!%p970_p5)
}
  0xe7   :  { %790 = dma.vmem_to_hbm [thread:$0]  %s788_s8, 128, %s1175_s4, [#allocation5]   ;;  %776 = vst [vmem:[#allocation10 + $0x3f] sm:$0x1] %v760_v62 }
  0xe8   :  { %s982_s13 = scalar_lea.vmem %s797_s10, 1024  ;;  %p987_p7 = scmp.lt.s32.totalorder %s797_s10, %s797_s10 }
  0xe9   :  { %p983_p6 = scmp.ne.s32.totalorder %s797_s10, %s982_s13  ;;  %p988_p8 = scmp.lt.s32.totalorder %s982_s13, %s982_s13 }
  0xeb   :  { %p989_p9 = por %p988_p8, %p987_p7 }
  0xed   :  { %p990_p10 = pnand %p989_p9, %p983_p6 }
  0xef   :  { %993 = shalt.err (!%p990_p10)
}
  0xf0   :  { %s1024_s14 = smov 128   ;;  %s1025_s15 = smov 8  }
  0xf1   :  { %802 = dma.vmem_to_hbm [thread:$0]  %s797_s10, 1024, %s1176_s5, [#allocation11], %s1024_s14, %s1024_s14, %s1025_s15  }
  0xf2   :  { %1006 = dma.done.wait [#allocation5], 128  }
  0xf3   :  { %1007 = vsyncadd [#allocation5], 4294967168 }
  0xf4   :  { %1008 = dma.done.wait [#allocation11], 1024  }
  0xf5   :  { %1009 = vsyncadd [#allocation11], 4294966272 }
  0xf6   :  { %809 = vsyncpa [#allocation4], 1 }
  0xf7   :  { %810 = vsyncpa [#allocation7], 1 }
  0xf8   :  { %811 = vsyncpa [#allocation5], 1 }
  0xf9   :  { %812 = vsyncpa [#allocation11], 1 }

</bundles_post_ra>
